<compile_context>
chip_gen: v7x
topology: tpu7x:2x2x1
jax: 0.10.0
libtpu: 0.0.40
codegen_flags: <defaults>
</compile_context>

<pallas_src>
import functools

import jax
import jax.numpy as jnp
from jax import lax
from jax.experimental import pallas as pl
from jax.experimental.pallas import tpu as pltpu

_EPS = 1e-5
_TINY_BYTES = 1 << 20          # below this, plain XLA beats any Pallas kernel
_TILE_TARGET_BYTES = 4 << 20   # ~1-4 MiB input tiles hit ~85% of HBM roofline


def _bn1d_kernel(x_ref, gamma_ref, beta_ref, o_ref):
    """Training-mode BatchNorm1d over the batch axis for an (N, TC) tile."""
    x = x_ref[...].astype(jnp.float32)                      # (N, TC)
    inv_n = 1.0 / x.shape[0]
    mean = jnp.sum(x, axis=0, keepdims=True) * inv_n        # (1, TC)
    sumsq = jnp.sum(x * x, axis=0, keepdims=True)           # single sweep over x
    # Biased variance via sum-of-squares (f32 accumulation). Clamp the tiny
    # negative values that cancellation can produce when |mean| >> std.
    var = jnp.maximum(sumsq * inv_n - mean * mean, 0.0)     # (1, TC)
    inv_std = lax.rsqrt(var + _EPS)                         # EUP slot (~free)
    # Fold affine params into per-channel scale/shift -> one FMA per element.
    scale = inv_std * gamma_ref[...].astype(jnp.float32)    # (1, TC)
    shift = beta_ref[...].astype(jnp.float32) - mean * scale
    o_ref[...] = (x * scale + shift).astype(o_ref.dtype)


def _round_up(v, m):
    return (v + m - 1) // m * m


@functools.lru_cache(maxsize=None)
def _vmem_limits():
    """Returns (vmem_limit_bytes for CompilerParams, tile-sizing budget)."""
    try:
        cap = int(pltpu.get_tpu_info().vmem_capacity_bytes)
    except Exception:  # conservative (v7x-sized) fallback
        cap = 64 << 20
    limit = min(cap // 2, 64 << 20)   # v5e/v6e: 64 MiB scoped, v7x: 32 MiB
    return limit, limit // 2


def _choose_channel_tile(n, c_pad, itemsize, budget):
    """Pick a 128-multiple channel tile width that divides c_pad."""
    total_x_bytes = n * c_pad * itemsize
    if total_x_bytes >= (4 << 20):
        want_steps = 4            # enough steps to overlap writeback with loads
    elif total_x_bytes >= _TINY_BYTES:
        want_steps = 2            # at least keep both v7x TensorCores busy
    else:
        want_steps = 1            # tiny (forced-Pallas) problems: single tile

    # Per-channel-column VMEM cost: double-buffered input + output tiles plus
    # the in-kernel f32 upcast working copy when the input is narrower than f32.
    upcast = 4 if itemsize < 4 else 0
    per_col = n * (2 * itemsize + 2 * itemsize + upcast)

    candidates = [tc for tc in range(128, c_pad + 1, 128) if c_pad % tc == 0]
    fitting = [tc for tc in candidates if per_col * tc <= budget]
    if not fitting:
        # TODO(synk): huge-N tiles overflow VMEM even at TC=128; this needs a
        # two-pass batch-axis tiling (sum/sumsq accumulators over an
        # "arbitrary" N grid axis) to bound VMEM independent of N.
        return 128

    def score(tc):
        tiles = c_pad // tc
        return (
            n * tc * itemsize <= _TILE_TARGET_BYTES,   # ~1-4 MiB per tile
            tiles >= want_steps,                       # enough pipeline steps
            want_steps == 1 or tiles % 2 == 0,         # even -> v7x 2-TC balance
            tc >= 512,                                 # lane-dense, low overhead
            tc,                                        # largest among ties
        )

    return max(fitting, key=score)


def _x_block_spec(n, tc, num_tiles):
    idx = lambda j: (0, j)
    if num_tiles >= 4:
        try:
            # Triple-buffer the streamed input: per-tile compute is trivial, so
            # DMA latency is the exposed cost once the grid pipelines.
            return pl.BlockSpec((n, tc), idx, pipeline_mode=pl.Buffered(3))
        except Exception:
            pass  # older Pallas without pipeline_mode -> default double buffer
    return pl.BlockSpec((n, tc), idx)


def _bn1d_xla(x, gamma, beta, eps=_EPS):
    """Plain-XLA reference / tiny-problem fallback (identical math)."""
    xf = x.astype(jnp.float32)
    mean = jnp.mean(xf, axis=0, keepdims=True)
    var = jnp.mean(jnp.square(xf - mean), axis=0, keepdims=True)
    out = (xf - mean) * lax.rsqrt(var + eps) * gamma + beta
    return out.astype(x.dtype)


@functools.partial(jax.jit, static_argnames=("use_pallas",))
def batchnorm1d(x, gamma, beta, use_pallas=None):
    """x: (N, C); gamma/beta: (1, C). Returns (N, C) in x.dtype."""
    n, c = x.shape
    itemsize = jnp.dtype(x.dtype).itemsize
    if use_pallas is None:
        use_pallas = n * c * itemsize >= _TINY_BYTES
    if not use_pallas:
        return _bn1d_xla(x, gamma, beta)

    vmem_limit, budget = _vmem_limits()

    # Pad channels to a multiple of 128 so stores stay lane-dense (unmasked
    # vst); the padded channels' stats are garbage-but-finite and sliced off.
    c_pad = _round_up(c, 128)
    if c_pad != c:
        x_p = jnp.pad(x, ((0, 0), (0, c_pad - c)))
        gamma_p = jnp.pad(gamma, ((0, 0), (0, c_pad - c)))
        beta_p = jnp.pad(beta, ((0, 0), (0, c_pad - c)))
    else:
        x_p, gamma_p, beta_p = x, gamma, beta

    tc = _choose_channel_tile(n, c_pad, itemsize, budget)
    num_tiles = c_pad // tc

    cost = pl.CostEstimate(
        flops=7 * n * c_pad,
        transcendentals=c_pad,
        bytes_accessed=2 * n * c_pad * itemsize + 2 * c_pad * 4,
    )

    out = pl.pallas_call(
        _bn1d_kernel,
        out_shape=jax.ShapeDtypeStruct((n, c_pad), x.dtype),
        grid=(num_tiles,),
        in_specs=[
            _x_block_spec(n, tc, num_tiles),
            pl.BlockSpec((1, tc), lambda j: (0, j)),
            pl.BlockSpec((1, tc), lambda j: (0, j)),
        ],
        out_specs=pl.BlockSpec((n, tc), lambda j: (0, j)),
        compiler_params=pltpu.CompilerParams(
            dimension_semantics=("parallel",),
            vmem_limit_bytes=vmem_limit,
        ),
        cost_estimate=cost,
    )(x_p, gamma_p, beta_p)

    return out if c_pad == c else out[:, :c]


class SingleBnNeckPallas:
    """JAX/Pallas port of SingleBnNeck (forward only)."""

    def __init__(self, in_channels, loss_names, use_pallas=None):
        self.loss_names = tuple(loss_names)
        self._use_pallas = use_pallas
        # _weights_init for BatchNorm: weight (gamma) = 1, bias (beta) = 0.
        self.gamma = jnp.ones((1, in_channels), jnp.float32)
        self.beta = jnp.zeros((1, in_channels), jnp.float32)

    def __call__(self, x):
        merged = batchnorm1d(x, self.gamma, self.beta, use_pallas=self._use_pallas)
        outputs = {}
        for name in self.loss_names:
            outputs[name] = x  # passthrough of the raw features
        outputs["merged"] = merged
        return outputs


if __name__ == "__main__":
    key = jax.random.PRNGKey(0)
    k0, k1, k2 = jax.random.split(key, 3)

    # 1) Small lane-aligned case; force the Pallas path (auto would pick XLA).
    N, C = 8, 256
    x = jax.random.normal(k0, (N, C), dtype=jnp.float32)
    neck = SingleBnNeckPallas(C, ("id_loss", "triplet_loss"), use_pallas=True)
    outputs = neck(x)
    jax.block_until_ready(outputs["merged"])
    ref = _bn1d_xla(x, neck.gamma, neck.beta)
    assert jnp.allclose(outputs["merged"], ref, atol=1e-4, rtol=1e-4)
    assert jnp.array_equal(outputs["id_loss"], x)
    assert jnp.array_equal(outputs["triplet_loss"], x)

    # 2) Channels not a multiple of 128: padded to 128 lanes, sliced back.
    N2, C2 = 16, 32
    x2 = jax.random.normal(k1, (N2, C2), dtype=jnp.float32)
    neck2 = SingleBnNeckPallas(C2, ("id_loss",), use_pallas=True)
    out2 = neck2(x2)
    jax.block_until_ready(out2["merged"])
    ref2 = _bn1d_xla(x2, neck2.gamma, neck2.beta)
    assert jnp.allclose(out2["merged"], ref2, atol=1e-4, rtol=1e-4)
    assert jnp.array_equal(out2["id_loss"], x2)

    # 3) Production-ish bnneck shape: auto path picks the multi-tile pipelined
    #    Pallas kernel (4 channel tiles, triple-buffered input).
    N3, C3 = 512, 2048
    x3 = jax.random.normal(k2, (N3, C3), dtype=jnp.float32)
    neck3 = SingleBnNeckPallas(C3, ("id_loss", "triplet_loss"))
    out3 = neck3(x3)
    jax.block_until_ready(out3["merged"])
    ref3 = _bn1d_xla(x3, neck3.gamma, neck3.beta)
    assert jnp.allclose(out3["merged"], ref3, atol=1e-4, rtol=1e-4)
    assert jnp.array_equal(out3["id_loss"], x3)

    print("KERNEL_OK")
</pallas_src>

<mosaic_0001>
module attributes {stable_mosaic.version = 11 : i64} {
  func.func @_bn1d_kernel(%arg0: i32, %arg1: memref<8x256xf32, #tpu.memory_space<vmem>>, %arg2: memref<1x256xf32, #tpu.memory_space<vmem>>, %arg3: memref<1x256xf32, #tpu.memory_space<vmem>>, %arg4: memref<8x256xf32, #tpu.memory_space<vmem>>) attributes {dimension_semantics = [#tpu.dimension_semantics<parallel>], iteration_bounds = array<i64: 1>, scalar_prefetch = 0 : i64, scratch_operands = 0 : i64, tpu.core_type = #tpu.core_type<tc>, window_params = [{transform_indices = @transform_0, window_bounds = array<i64: 8, 256>}, {transform_indices = @transform_1, window_bounds = array<i64: 1, 256>}, {transform_indices = @transform_2, window_bounds = array<i64: 1, 256>}, {transform_indices = @transform_3, window_bounds = array<i64: 8, 256>}]} {
    %c0 = arith.constant 0 : index
    %c0_0 = arith.constant 0 : index
    %0 = vector.load %arg1[%c0, %c0_0] : memref<8x256xf32, #tpu.memory_space<vmem>>, vector<8x256xf32>
    %cst = arith.constant dense<0.000000e+00> : vector<256xf32>
    %1 = vector.multi_reduction <add>, %0, %cst [0] : vector<8x256xf32> to vector<256xf32>
    %2 = vector.shape_cast %1 : vector<256xf32> to vector<1x256xf32>
    %cst_1 = arith.constant 1.250000e-01 : f32
    %3 = vector.broadcast %cst_1 : f32 to vector<1x256xf32>
    %4 = arith.mulf %2, %3 : vector<1x256xf32>
    %5 = arith.mulf %0, %0 : vector<8x256xf32>
    %cst_2 = arith.constant dense<0.000000e+00> : vector<256xf32>
    %6 = vector.multi_reduction <add>, %5, %cst_2 [0] : vector<8x256xf32> to vector<256xf32>
    %7 = vector.shape_cast %6 : vector<256xf32> to vector<1x256xf32>
    %cst_3 = arith.constant 1.250000e-01 : f32
    %8 = vector.broadcast %cst_3 : f32 to vector<1x256xf32>
    %9 = arith.mulf %7, %8 : vector<1x256xf32>
    %10 = arith.mulf %4, %4 : vector<1x256xf32>
    %11 = arith.subf %9, %10 : vector<1x256xf32>
    %cst_4 = arith.constant 0.000000e+00 : f32
    %12 = vector.broadcast %cst_4 : f32 to vector<1x256xf32>
    %13 = arith.maximumf %11, %12 : vector<1x256xf32>
    %cst_5 = arith.constant 9.99999974E-6 : f32
    %14 = vector.broadcast %cst_5 : f32 to vector<1x256xf32>
    %15 = arith.addf %13, %14 : vector<1x256xf32>
    %16 = math.rsqrt %15 : vector<1x256xf32>
    %c0_6 = arith.constant 0 : index
    %c0_7 = arith.constant 0 : index
    %17 = vector.load %arg2[%c0_6, %c0_7] : memref<1x256xf32, #tpu.memory_space<vmem>>, vector<1x256xf32>
    %18 = arith.mulf %16, %17 : vector<1x256xf32>
    %c0_8 = arith.constant 0 : index
    %c0_9 = arith.constant 0 : index
    %19 = vector.load %arg3[%c0_8, %c0_9] : memref<1x256xf32, #tpu.memory_space<vmem>>, vector<1x256xf32>
    %20 = arith.mulf %4, %18 : vector<1x256xf32>
    %21 = arith.subf %19, %20 : vector<1x256xf32>
    %22 = vector.broadcast %18 : vector<1x256xf32> to vector<8x256xf32>
    %23 = arith.mulf %0, %22 : vector<8x256xf32>
    %24 = vector.broadcast %21 : vector<1x256xf32> to vector<8x256xf32>
    %25 = arith.addf %23, %24 : vector<8x256xf32>
    %c0_10 = arith.constant 0 : index
    %c0_11 = arith.constant 0 : index
    %26 = vector.load %arg4[%c0_10, %c0_11] : memref<8x256xf32, #tpu.memory_space<vmem>>, vector<8x256xf32>
    tpu.vector_store %arg4[%c0_10, %c0_11], %25 {strides = array<i32>} : memref<8x256xf32, #tpu.memory_space<vmem>>, vector<8x256xf32>,
    return
  }
  func.func @transform_0(%arg0: i32) -> (i32, i32) {
    %c0_i32 = arith.constant 0 : i32
    %c0_i32_0 = arith.constant 0 : i32
    return %c0_i32, %arg0 : i32, i32
  }
  func.func @transform_1(%arg0: i32) -> (i32, i32) {
    %c0_i32 = arith.constant 0 : i32
    %c0_i32_0 = arith.constant 0 : i32
    return %c0_i32, %arg0 : i32, i32
  }
  func.func @transform_2(%arg0: i32) -> (i32, i32) {
    %c0_i32 = arith.constant 0 : i32
    %c0_i32_0 = arith.constant 0 : i32
    return %c0_i32, %arg0 : i32, i32
  }
  func.func @transform_3(%arg0: i32) -> (i32, i32) {
    %c0_i32 = arith.constant 0 : i32
    %c0_i32_0 = arith.constant 0 : i32
    return %c0_i32, %arg0 : i32, i32
  }
}

</mosaic_0001>

<bundles_post_ra>
// kernel: batchnorm1d.1
= control target key start
LH: loop header
LB: loop body
LE: loop exit
PB: predicated region body
PF: predicated region fallthrough
CT: control target
= control target key end

     0   :  { %8 = vsyncpa [#allocation3], 0  ;;  %s267_s0 = inlined_call_operand.hbm [shape: f32[8,256], index: 0, kind: input, shape index: {}]   ;;  %s268_s1 = inlined_call_operand.vmem [shape: f32[1,256], index: 1, kind: input, shape index: {}]   ;;  %s269_s2 = inlined_call_operand.vmem [shape: f32[1,256], index: 2, kind: input, shape index: {}]   ;;  %s270_s3 = inlined_call_operand.hbm [shape: f32[8,256], index: 3, kind: output, shape index: {}]  }
   0x1   :  { %9 = vsyncpa [#allocation4], 0  ;;  %s200_s12 = smov [#allocation2]   ;;  %s152_s16 = scalar_lea.hbm %s267_s0, 256 }
   0x2   :  { %s16_s13 = sshll.u32 %s200_s12, 4  ;;  %p153_p0 = scmp.ne.s32.totalorder %s267_s0, %s152_s16  ;;  %s17_s13 = int_to_ptr.vmem [resolvable:$true] %s16_s13 }
   0x3   :  { %p156_p1 = scmp.lt.u32.totalorder %s152_s16, %s267_s0 }
   0x5   :  { %p158_p2 = pnand %p156_p1, %p153_p0 }
   0x7   :  { %161 = shalt.err (!%p158_p2)
}
   0x8   :  { %s162_s21 = scalar_lea.vmem %s17_s13, 256  ;;  %p167_p4 = scmp.lt.s32.totalorder %s17_s13, %s17_s13 }
   0x9   :  { %p163_p3 = scmp.ne.s32.totalorder %s17_s13, %s162_s21  ;;  %p168_p5 = scmp.lt.s32.totalorder %s162_s21, %s162_s21 }
   0xb   :  { %p169_p6 = por %p168_p5, %p167_p4 }
   0xd   :  { %p170_p7 = pnand %p169_p6, %p163_p3 }
   0xf   :  { %173 = shalt.err (!%p170_p7)
}
  0x10   :  { %19 = dma.hbm_to_vmem [thread:$0]  %s267_s0, 256, %s17_s13, [#allocation3]  }
  0x11   :  { %196 = dma.done.wait [#allocation3], 256  }
  0x12   :  { %197 = vsyncadd [#allocation3], 4294967040  ;;  %v235_v0 = vld [vmem:[#allocation2] sm:$0xff]  ;;  %v237_v1 = vld [vmem:[#allocation2 + $0x8] sm:$0xff]  ;;  %v71_v36 = vlaneseq  ;;  %v201_v45 = vmov 1966171168  }
  0x13   :  { %v29_v2 = vrot.slane %v235_v0, 4  ;;  %v35_v3 = vrot.slane %v237_v1, 4  ;;  %v43_v4 = vmul.f32 %v235_v0, %v235_v0  ;;  %v44_v5 = vmul.f32 %v237_v1, %v237_v1  ;;  %v69_v43 = vld [vmem:[%s268_s1] sm:$0x3]  ;;  %s202_s1 = smov [#allocation5]  }
  0x14   :  { %v72_v41 = vshrl.u32 %v71_v36, 7  ;;  %v90_v46 = vunpack.c.l.s4 %v201_v45  ;;  %v83_v61 = vld [vmem:[%s269_s2] sm:$0x3]  ;;  %s136_s27 = sshll.u32 %s202_s1, 4  ;;  %s137_s27 = int_to_ptr.vmem [resolvable:$true] %s136_s27 }
  0x15   :  { %v30_v6 = vadd.f32 %v29_v2, %v235_v0  ;;  %v36_v7 = vadd.f32 %v35_v3, %v237_v1  ;;  %v45_v8 = vrot.slane %v43_v4, 4  ;;  %v51_v9 = vrot.slane %v44_v5, 4  ;;  %s174_s28 = scalar_lea.vmem %s137_s27, 256  ;;  %p179_p9 = scmp.lt.s32.totalorder %s137_s27, %s137_s27 }
  0x16   :  { %v73_v42 = vsub.s32 0, %v72_v41  ;;  %v77_v44 = vsub.s32 1, %v72_v41  ;;  %v91_v50 = vunpack.c.0.s8 %v90_v46  ;;  %p175_p8 = scmp.ne.s32.totalorder %s137_s27, %s174_s28  ;;  %p180_p10 = scmp.lt.s32.totalorder %s174_s28, %s174_s28 }
  0x17   :  { %v31_v10 = vrot.slane %v30_v6, 2  ;;  %v37_v11 = vrot.slane %v36_v7, 2  ;;  %v46_v12 = vadd.f32 %v45_v8, %v43_v4  ;;  %v52_v13 = vadd.f32 %v51_v9, %v44_v5 }
  0x18   :  { %v74_v47 = vrot.slane %v69_v43, %v73_v42  ;;  %v78_v48 = vrot.slane %v69_v43, %v77_v44  ;;  %v94_v56 = vsub.s32 %v91_v50, %v72_v41  ;;  %p181_p11 = por %p180_p10, %p179_p9 }
  0x19   :  { %v32_v14 = vadd.f32 %v31_v10, %v30_v6  ;;  %v38_v15 = vadd.f32 %v37_v11, %v36_v7  ;;  %v47_v16 = vrot.slane %v46_v12, 2  ;;  %v53_v17 = vrot.slane %v52_v13, 2 }
  0x1a   :  { %p182_p12 = pnand %p181_p11, %p175_p8 }
  0x1b   :  { %v33_v18 = vrot.slane %v32_v14, 1  ;;  %v39_v19 = vrot.slane %v38_v15, 1  ;;  %v48_v20 = vadd.f32 %v47_v16, %v46_v12  ;;  %v54_v21 = vadd.f32 %v53_v17, %v52_v13 }
  0x1d   :  { %v34_v22 = vadd.f32 %v33_v18, %v32_v14  ;;  %v40_v23 = vadd.f32 %v39_v19, %v38_v15  ;;  %v49_v24 = vrot.slane %v48_v20, 1  ;;  %v55_v25 = vrot.slane %v54_v21, 1 }
  0x1f   :  { %v41_v26 = vmul.f32 0.125, %v34_v22  ;;  %v42_v27 = vmul.f32 0.125, %v40_v23  ;;  %v50_v28 = vadd.f32 %v49_v24, %v48_v20  ;;  %v56_v29 = vadd.f32 %v55_v25, %v54_v21 }
  0x21   :  { %v57_v30 = vmul.f32 0.125, %v50_v28  ;;  %v58_v31 = vmul.f32 0.125, %v56_v29  ;;  %v59_v32 = vmul.f32 %v41_v26, %v41_v26  ;;  %v60_v33 = vmul.f32 %v42_v27, %v42_v27 }
  0x23   :  { %v61_v34 = vsub.f32 %v57_v30, %v59_v32  ;;  %v62_v35 = vsub.f32 %v58_v31, %v60_v33 }
  0x25   :  { %v63_v37 = vmax.f32 %v61_v34, 0.0  ;;  %v64_v38 = vmax.f32 %v62_v35, 0.0 }
  0x27   :  { %v65_v39 = vadd.f32 1e-05, %v63_v37  ;;  %v66_v40 = vadd.f32 1e-05, %v64_v38 }
  0x29   :  { %148 = vrsqrt.f32 %v65_v39 }
  0x2a   :  { %150 = vrsqrt.f32 %v66_v40 }
  0x33   :  { %v149_v49 = vpop.eup %148 }
  0x34   :  { %v151_v51 = vpop.eup %150  ;;  %v81_v52 = vmul.f32 %v149_v49, %v74_v47 }
  0x35   :  { %v82_v53 = vmul.f32 %v151_v51, %v78_v48 }
  0x36   :  { %v84_v54 = vmul.f32 %v81_v52, %v41_v26  ;;  %v108_v59 = vrot.slane %v81_v52, %v73_v42 }
  0x37   :  { %v85_v55 = vmul.f32 %v82_v53, %v42_v27  ;;  %v112_v60 = vrot.slane %v82_v53, %v73_v42 }
  0x38   :  { %v113_v2 = vmul.f32 %v108_v59, %v235_v0 }
  0x39   :  { %v88_v57 = vcombine.low %v84_v54, %v85_v55  ;;  %v114_v3 = vmul.f32 %v112_v60, %v237_v1 }
  0x3b   :  { %v95_v58 = vrot.slane %v88_v57, %v94_v56 }
  0x3d   :  { %v102_v62 = vrot.slane %v95_v58, %v94_v56 }
  0x3f   :  { %v104_v63 = vsub.f32 %v83_v61, %v102_v62 }
  0x41   :  { %v119_v4 = vrot.slane %v104_v63, %v73_v42  ;;  %v123_v5 = vrot.slane %v104_v63, %v77_v44 }
  0x43   :  { %v126_v6 = vadd.f32 %v119_v4, %v113_v2  ;;  %v127_v7 = vadd.f32 %v123_v5, %v114_v3 }
  0x45   :  { %128 = vst [vmem:[#allocation5] sm:$0xff] %v126_v6  ;;  %129 = vst [vmem:[#allocation5 + $0x8] sm:$0xff] %v127_v7 }
  0x46   :  { %185 = shalt.err (!%p182_p12)
}
  0x47   :  { %s186_s30 = scalar_lea.hbm %s270_s3, 256 }
  0x48   :  { %p187_p13 = scmp.ne.s32.totalorder %s270_s3, %s186_s30  ;;  %p190_p0 = scmp.lt.u32.totalorder %s186_s30, %s270_s3 }
  0x4a   :  { %p192_p1 = pnand %p190_p0, %p187_p13 }
  0x4c   :  { %195 = shalt.err (!%p192_p1)
}
  0x4d   :  { %139 = dma.vmem_to_hbm [thread:$0]  %s137_s27, 256, %s270_s3, [#allocation4]  }
  0x4e   :  { %198 = dma.done.wait [#allocation4], 256  }
  0x4f   :  { %199 = vsyncadd [#allocation4], 4294967040 }
  0x50   :  { %143 = vsyncpa [#allocation3], 1 }
  0x51   :  { %144 = vsyncpa [#allocation4], 1 }

</bundles_post_ra>
